<compile_context>
chip_gen: v7x
topology: tpu7x:2x2x1
jax: 0.10.0
libtpu: 0.0.40
codegen_flags: <defaults>
</compile_context>

<pallas_src>
import functools

import jax
import jax.numpy as jnp
from jax.experimental import pallas as pl
from jax.experimental.pallas import tpu as pltpu


def _round_up(x, m):
    return ((x + m - 1) // m) * m


def _model_with_head_kernel(x_ref, we_ref, be_ref, w1_ref, b1_ref,
                            w2_ref, b2_ref, o_ref):
    # x_ref: (TB, C*HW) f32 -- avg-pool already folded into we_ref.
    x = x_ref[...]

    # ---- encoder: (pool + Linear) as one matmul, then ReLU ----
    feat = jnp.dot(x, we_ref[...],
                   preferred_element_type=jnp.float32) + be_ref[...]
    feat = jnp.maximum(feat, 0.0)                                   # (TB, Dp)

    # ---- head: Linear -> ReLU -> Linear ----
    h = jnp.dot(feat, w1_ref[...],
                preferred_element_type=jnp.float32) + b1_ref[...]
    h = jnp.maximum(h, 0.0)                                         # (TB, Dp)
    out = jnp.dot(h, w2_ref[...],
                  preferred_element_type=jnp.float32) + b2_ref[...]  # (TB, Fp)

    # ---- F.normalize(out, dim=1): out / max(||out||, 1e-12)  ==
    #      out * rsqrt(max(sum(out^2), 1e-24))  (single EUP op in the tail) ----
    sumsq = jnp.sum(out * out, axis=1, keepdims=True)
    o_ref[...] = out * jax.lax.rsqrt(jnp.maximum(sumsq, 1e-24))


@functools.partial(jax.jit, static_argnames=("tb",))
def model_with_head(x_nchw, params, *, tb=None):
    """x_nchw: (B, C, H, W) float32; returns (B, feat_dim) L2-normalized."""
    B, C, H, W = x_nchw.shape
    we, be, w1, b1, w2, b2 = params
    dim_in = we.shape[1]
    feat_dim = w2.shape[1]
    HW = H * W
    K = C * HW

    # Fold the global average pool into the encoder weight:
    #   mean_s(x[b,c,s]) @ we  ==  x.reshape(B, C*HW) @ (repeat(we, HW)/HW)
    we_fold = jnp.repeat(we, HW, axis=0) / jnp.float32(HW)           # (K, dim_in)

    # Pad feature dims to 128-lane tiles (zero-padded weights keep math exact).
    dim_p = _round_up(dim_in, 128)
    feat_p = _round_up(feat_dim, 128)

    we_p = jnp.zeros((K, dim_p), jnp.float32).at[:, :dim_in].set(we_fold)
    be_p = jnp.zeros((1, dim_p), jnp.float32).at[:, :dim_in].set(be)
    w1_p = jnp.zeros((dim_p, dim_p), jnp.float32).at[:dim_in, :dim_in].set(w1)
    b1_p = jnp.zeros((1, dim_p), jnp.float32).at[:, :dim_in].set(b1)
    w2_p = jnp.zeros((dim_p, feat_p), jnp.float32).at[:dim_in, :feat_dim].set(w2)
    b2_p = jnp.zeros((1, feat_p), jnp.float32).at[:, :feat_dim].set(b2)

    # Batch tile: sublane-aligned; 128 rows per step for large batches
    # (small enough to double-buffer comfortably within v7x's 64 MiB VMEM).
    if tb is None:
        tb = 128 if B >= 128 else _round_up(B, 8)
    b_pad = _round_up(B, tb)

    x_flat = x_nchw.reshape(B, K).astype(jnp.float32)
    x_p = jnp.zeros((b_pad, K), jnp.float32).at[:B].set(x_flat)

    grid = (b_pad // tb,)
    out = pl.pallas_call(
        _model_with_head_kernel,
        out_shape=jax.ShapeDtypeStruct((b_pad, feat_p), jnp.float32),
        grid=grid,
        in_specs=[
            pl.BlockSpec((tb, K), lambda i: (i, 0)),        # x: pipelined per tile
            pl.BlockSpec((K, dim_p), lambda i: (0, 0)),     # weights: VMEM-resident
            pl.BlockSpec((1, dim_p), lambda i: (0, 0)),
            pl.BlockSpec((dim_p, dim_p), lambda i: (0, 0)),
            pl.BlockSpec((1, dim_p), lambda i: (0, 0)),
            pl.BlockSpec((dim_p, feat_p), lambda i: (0, 0)),
            pl.BlockSpec((1, feat_p), lambda i: (0, 0)),
        ],
        out_specs=pl.BlockSpec((tb, feat_p), lambda i: (i, 0)),
        compiler_params=pltpu.CompilerParams(
            dimension_semantics=("parallel",)),
    )(x_p, we_p, be_p, w1_p, b1_p, w2_p, b2_p)

    return out[:B, :feat_dim]


def init_params(key, C, dim_in, feat_dim):
    k0, k1, k2 = jax.random.split(key, 3)
    # deterministic, roughly kaiming-scaled init (synthetic weights)
    we = jax.random.normal(k0, (C, dim_in), jnp.float32) * (2.0 / C) ** 0.5
    be = jnp.zeros((1, dim_in), jnp.float32)
    w1 = jax.random.normal(k1, (dim_in, dim_in), jnp.float32) * (2.0 / dim_in) ** 0.5
    b1 = jnp.zeros((1, dim_in), jnp.float32)
    w2 = jax.random.normal(k2, (dim_in, feat_dim), jnp.float32) * (1.0 / dim_in) ** 0.5
    b2 = jnp.zeros((1, feat_dim), jnp.float32)
    return we, be, w1, b1, w2, b2


def reference(x_nchw, params):
    we, be, w1, b1, w2, b2 = params
    B, C, H, W = x_nchw.shape
    pooled = jnp.mean(x_nchw.reshape(B, C, H * W), axis=-1)
    feat = jnp.maximum(pooled @ we + be, 0.0)
    h = jnp.maximum(feat @ w1 + b1, 0.0)
    out = h @ w2 + b2
    norm = jnp.sqrt(jnp.sum(out * out, axis=1, keepdims=True))
    return out / jnp.maximum(norm, 1e-12)


if __name__ == "__main__":
    B, C, H, W = 2, 4, 16, 16
    dim_in, feat_dim = 32, 128

    key = jax.random.PRNGKey(0)
    kx, kp = jax.random.split(key)
    x = jax.random.normal(kx, (B, C, H, W), jnp.float32)
    params = init_params(kp, C, dim_in, feat_dim)

    out = model_with_head(x, params)
    out = jax.block_until_ready(out)

    ref = reference(x, params)
    assert out.shape == (B, feat_dim)
    assert jnp.allclose(out, ref, atol=1e-5, rtol=1e-5), "mismatch vs reference"

    print("KERNEL_OK")
</pallas_src>

<mosaic_0001>
module attributes {stable_mosaic.version = 11 : i64} {
  func.func @_model_with_head_kernel(%arg0: i32, %arg1: memref<8x1024xf32, #tpu.memory_space<vmem>>, %arg2: memref<1024x128xf32, #tpu.memory_space<vmem>>, %arg3: memref<1x128xf32, #tpu.memory_space<vmem>>, %arg4: memref<128x128xf32, #tpu.memory_space<vmem>>, %arg5: memref<1x128xf32, #tpu.memory_space<vmem>>, %arg6: memref<128x128xf32, #tpu.memory_space<vmem>>, %arg7: memref<1x128xf32, #tpu.memory_space<vmem>>, %arg8: memref<8x128xf32, #tpu.memory_space<vmem>>) attributes {dimension_semantics = [#tpu.dimension_semantics<parallel>], iteration_bounds = array<i64: 1>, scalar_prefetch = 0 : i64, scratch_operands = 0 : i64, tpu.core_type = #tpu.core_type<tc>, window_params = [{transform_indices = @transform_0, window_bounds = array<i64: 8, 1024>}, {pipeline_mode = #tpu.pipeline_mode<synchronous>, transform_indices = @transform_1, window_bounds = array<i64: 1024, 128>}, {pipeline_mode = #tpu.pipeline_mode<synchronous>, transform_indices = @transform_2, window_bounds = array<i64: 1, 128>}, {pipeline_mode = #tpu.pipeline_mode<synchronous>, transform_indices = @transform_3, window_bounds = array<i64: 128, 128>}, {pipeline_mode = #tpu.pipeline_mode<synchronous>, transform_indices = @transform_4, window_bounds = array<i64: 1, 128>}, {pipeline_mode = #tpu.pipeline_mode<synchronous>, transform_indices = @transform_5, window_bounds = array<i64: 128, 128>}, {pipeline_mode = #tpu.pipeline_mode<synchronous>, transform_indices = @transform_6, window_bounds = array<i64: 1, 128>}, {transform_indices = @transform_7, window_bounds = array<i64: 8, 128>}]} {
    %c0 = arith.constant 0 : index
    %c0_0 = arith.constant 0 : index
    %0 = vector.load %arg1[%c0, %c0_0] : memref<8x1024xf32, #tpu.memory_space<vmem>>, vector<8x1024xf32>
    %c0_1 = arith.constant 0 : index
    %c0_2 = arith.constant 0 : index
    %1 = vector.load %arg2[%c0_1, %c0_2] : memref<1024x128xf32, #tpu.memory_space<vmem>>, vector<1024x128xf32>
    %cst = arith.constant dense<0.000000e+00> : vector<8x128xf32>
    %2 = tpu.matmul %0, %1, %cst {dimension_numbers = #tpu.dot_dimension_numbers<[1], [0], [0], [1], [0, 0, 1, 1], [], []>} : vector<8x1024xf32>, vector<1024x128xf32>, vector<8x128xf32> -> vector<8x128xf32>
    %c0_3 = arith.constant 0 : index
    %c0_4 = arith.constant 0 : index
    %3 = vector.load %arg3[%c0_3, %c0_4] : memref<1x128xf32, #tpu.memory_space<vmem>>, vector<1x128xf32>
    %4 = vector.broadcast %3 : vector<1x128xf32> to vector<8x128xf32>
    %5 = arith.addf %2, %4 : vector<8x128xf32>
    %cst_5 = arith.constant 0.000000e+00 : f32
    %6 = vector.broadcast %cst_5 : f32 to vector<8x128xf32>
    %7 = arith.maximumf %5, %6 : vector<8x128xf32>
    %c0_6 = arith.constant 0 : index
    %c0_7 = arith.constant 0 : index
    %8 = vector.load %arg4[%c0_6, %c0_7] : memref<128x128xf32, #tpu.memory_space<vmem>>, vector<128x128xf32>
    %cst_8 = arith.constant dense<0.000000e+00> : vector<8x128xf32>
    %9 = tpu.matmul %7, %8, %cst_8 {dimension_numbers = #tpu.dot_dimension_numbers<[1], [0], [0], [1], [0, 0, 1, 1], [], []>} : vector<8x128xf32>, vector<128x128xf32>, vector<8x128xf32> -> vector<8x128xf32>
    %c0_9 = arith.constant 0 : index
    %c0_10 = arith.constant 0 : index
    %10 = vector.load %arg5[%c0_9, %c0_10] : memref<1x128xf32, #tpu.memory_space<vmem>>, vector<1x128xf32>
    %11 = vector.broadcast %10 : vector<1x128xf32> to vector<8x128xf32>
    %12 = arith.addf %9, %11 : vector<8x128xf32>
    %cst_11 = arith.constant 0.000000e+00 : f32
    %13 = vector.broadcast %cst_11 : f32 to vector<8x128xf32>
    %14 = arith.maximumf %12, %13 : vector<8x128xf32>
    %c0_12 = arith.constant 0 : index
    %c0_13 = arith.constant 0 : index
    %15 = vector.load %arg6[%c0_12, %c0_13] : memref<128x128xf32, #tpu.memory_space<vmem>>, vector<128x128xf32>
    %cst_14 = arith.constant dense<0.000000e+00> : vector<8x128xf32>
    %16 = tpu.matmul %14, %15, %cst_14 {dimension_numbers = #tpu.dot_dimension_numbers<[1], [0], [0], [1], [0, 0, 1, 1], [], []>} : vector<8x128xf32>, vector<128x128xf32>, vector<8x128xf32> -> vector<8x128xf32>
    %c0_15 = arith.constant 0 : index
    %c0_16 = arith.constant 0 : index
    %17 = vector.load %arg7[%c0_15, %c0_16] : memref<1x128xf32, #tpu.memory_space<vmem>>, vector<1x128xf32>
    %18 = vector.broadcast %17 : vector<1x128xf32> to vector<8x128xf32>
    %19 = arith.addf %16, %18 : vector<8x128xf32>
    %20 = arith.mulf %19, %19 : vector<8x128xf32>
    %cst_17 = arith.constant dense<0.000000e+00> : vector<8xf32>
    %21 = vector.multi_reduction <add>, %20, %cst_17 [1] : vector<8x128xf32> to vector<8xf32>
    %22 = vector.shape_cast %21 : vector<8xf32> to vector<8x1xf32>
    %cst_18 = arith.constant 1.000000e-24 : f32
    %23 = vector.broadcast %cst_18 : f32 to vector<8x1xf32>
    %24 = arith.maximumf %22, %23 : vector<8x1xf32>
    %25 = math.rsqrt %24 : vector<8x1xf32>
    %26 = vector.broadcast %25 : vector<8x1xf32> to vector<8x128xf32>
    %27 = arith.mulf %19, %26 : vector<8x128xf32>
    %c0_19 = arith.constant 0 : index
    %c0_20 = arith.constant 0 : index
    %28 = vector.load %arg8[%c0_19, %c0_20] : memref<8x128xf32, #tpu.memory_space<vmem>>, vector<8x128xf32>
    tpu.vector_store %arg8[%c0_19, %c0_20], %27 {strides = array<i32>} : memref<8x128xf32, #tpu.memory_space<vmem>>, vector<8x128xf32>,
    return
  }
  func.func @transform_0(%arg0: i32) -> (i32, i32) {
    %c0_i32 = arith.constant 0 : i32
    %c0_i32_0 = arith.constant 0 : i32
    return %arg0, %c0_i32 : i32, i32
  }
  func.func @transform_1(%arg0: i32) -> (i32, i32) {
    %c0_i32 = arith.constant 0 : i32
    %c0_i32_0 = arith.constant 0 : i32
    %c0_i32_1 = arith.constant 0 : i32
    return %c0_i32, %c0_i32_0 : i32, i32
  }
  func.func @transform_2(%arg0: i32) -> (i32, i32) {
    %c0_i32 = arith.constant 0 : i32
    %c0_i32_0 = arith.constant 0 : i32
    %c0_i32_1 = arith.constant 0 : i32
    return %c0_i32, %c0_i32_0 : i32, i32
  }
  func.func @transform_3(%arg0: i32) -> (i32, i32) {
    %c0_i32 = arith.constant 0 : i32
    %c0_i32_0 = arith.constant 0 : i32
    %c0_i32_1 = arith.constant 0 : i32
    return %c0_i32, %c0_i32_0 : i32, i32
  }
  func.func @transform_4(%arg0: i32) -> (i32, i32) {
    %c0_i32 = arith.constant 0 : i32
    %c0_i32_0 = arith.constant 0 : i32
    %c0_i32_1 = arith.constant 0 : i32
    return %c0_i32, %c0_i32_0 : i32, i32
  }
  func.func @transform_5(%arg0: i32) -> (i32, i32) {
    %c0_i32 = arith.constant 0 : i32
    %c0_i32_0 = arith.constant 0 : i32
    %c0_i32_1 = arith.constant 0 : i32
    return %c0_i32, %c0_i32_0 : i32, i32
  }
  func.func @transform_6(%arg0: i32) -> (i32, i32) {
    %c0_i32 = arith.constant 0 : i32
    %c0_i32_0 = arith.constant 0 : i32
    %c0_i32_1 = arith.constant 0 : i32
    return %c0_i32, %c0_i32_0 : i32, i32
  }
  func.func @transform_7(%arg0: i32) -> (i32, i32) {
    %c0_i32 = arith.constant 0 : i32
    %c0_i32_0 = arith.constant 0 : i32
    return %arg0, %c0_i32 : i32, i32
  }
}

</mosaic_0001>

<bundles_post_ra>
// kernel: model_with_head.1
= control target key start
LH: loop header
LB: loop body
LE: loop exit
PB: predicated region body
PF: predicated region fallthrough
CT: control target
= control target key end

     0   :  { %vm1077_vm0 = vmmov 0   ;;  %s1651_s1 = inlined_call_operand.vmem [shape: f32[1024,128], index: 1, kind: input, shape index: {}]   ;;  %s1652_s0 = inlined_call_operand.vmem [shape: f32[8,1024], index: 0, kind: input, shape index: {}]   ;;  %s1653_s3 = inlined_call_operand.vmem [shape: f32[128,128], index: 3, kind: input, shape index: {}]   ;;  %s1654_s5 = inlined_call_operand.vmem [shape: f32[128,128], index: 5, kind: input, shape index: {}]   ;;  %s1655_s2 = inlined_call_operand.vmem [shape: f32[1,128], index: 2, kind: input, shape index: {}]   ;;  %s1656_s4 = inlined_call_operand.vmem [shape: f32[1,128], index: 4, kind: input, shape index: {}]   ;;  %s1657_s6 = inlined_call_operand.vmem [shape: f32[1,128], index: 6, kind: input, shape index: {}]   ;;  %s1658_s7 = inlined_call_operand.vmem [shape: f32[8,128], index: 7, kind: output, shape index: {}]  }
   0x1   :  { %v50_v0 = vld [vmem:[%s1651_s1 + $0x80] sm:$0xff]  ;;  %v51_v1 = vld [vmem:[%s1651_s1 + $0x88] sm:$0xff]  ;;  %v52_v11 = vld [vmem:[%s1651_s1 + $0x90] sm:$0xff] }
   0x2   :  { %v34_v2 = vld [vmem:[%s1651_s1] sm:$0xff]  ;;  %v895_v3 = vpack.c.bf16 %v51_v1, %v50_v0  ;;  %v35_v4 = vld [vmem:[%s1651_s1 + $0x8] sm:$0xff]  ;;  %v53_v13 = vld [vmem:[%s1651_s1 + $0x98] sm:$0xff] }
   0x3   :  { %v82_v5 = vld [vmem:[%s1651_s1 + $0x180] sm:$0xff]  ;;  %v83_v6 = vld [vmem:[%s1651_s1 + $0x188] sm:$0xff]  ;;  %v897_v7 = vpack.c.bf16 %v35_v4, %v34_v2  ;;  %v36_v14 = vld [vmem:[%s1651_s1 + $0x10] sm:$0xff]  ;;  %v899_v16 = vpack.c.bf16 %v53_v13, %v52_v11 }
   0x4   :  { %v927_v8 = vpack.c.bf16 %v83_v6, %v82_v5  ;;  %v66_v9 = vld [vmem:[%s1651_s1 + $0x100] sm:$0xff]  ;;  %v67_v10 = vld [vmem:[%s1651_s1 + $0x108] sm:$0xff]  ;;  %896 = vmatprep.subr.bf16.mxu0 %v895_v3  ;;  %v37_v15 = vld [vmem:[%s1651_s1 + $0x18] sm:$0xff] }
   0x5   :  { %v929_v12 = vpack.c.bf16 %v67_v10, %v66_v9  ;;  %898 = vmatpush3.bf16.msra.mxu0 %v897_v7  ;;  %v901_v17 = vpack.c.bf16 %v37_v15, %v36_v14  ;;  %v84_v18 = vld [vmem:[%s1651_s1 + $0x190] sm:$0xff]  ;;  %v85_v19 = vld [vmem:[%s1651_s1 + $0x198] sm:$0xff]  ;;  %v54_v23 = vld [vmem:[%s1651_s1 + $0xa0] sm:$0xff] }
   0x6   :  { %928 = vmatprep.subr.bf16.mxu1 %v927_v8  ;;  %v68_v20 = vld [vmem:[%s1651_s1 + $0x110] sm:$0xff]  ;;  %v931_v21 = vpack.c.bf16 %v85_v19, %v84_v18  ;;  %v69_v22 = vld [vmem:[%s1651_s1 + $0x118] sm:$0xff]  ;;  %v55_v24 = vld [vmem:[%s1651_s1 + $0xa8] sm:$0xff]  ;;  %900 = vmatprep.subr.bf16.mxu0 %v899_v16 }
   0x7   :  { %930 = vmatpush3.bf16.msra.mxu1 %v929_v12  ;;  %v933_v25 = vpack.c.bf16 %v69_v22, %v68_v20  ;;  %v903_v26 = vpack.c.bf16 %v55_v24, %v54_v23  ;;  %v38_v27 = vld [vmem:[%s1651_s1 + $0x20] sm:$0xff]  ;;  %v39_v28 = vld [vmem:[%s1651_s1 + $0x28] sm:$0xff]  ;;  %v56_v35 = vld [vmem:[%s1651_s1 + $0xb0] sm:$0xff] }
   0x8   :  { %v86_v29 = vld [vmem:[%s1651_s1 + $0x1a0] sm:$0xff]  ;;  %932 = vmatprep.subr.bf16.mxu1 %v931_v21  ;;  %v87_v30 = vld [vmem:[%s1651_s1 + $0x1a8] sm:$0xff]  ;;  %v905_v33 = vpack.c.bf16 %v39_v28, %v38_v27  ;;  %v57_v36 = vld [vmem:[%s1651_s1 + $0xb8] sm:$0xff] }
   0x9   :  { %v70_v31 = vld [vmem:[%s1651_s1 + $0x120] sm:$0xff]  ;;  %v71_v32 = vld [vmem:[%s1651_s1 + $0x128] sm:$0xff]  ;;  %902 = vmatpush3.bf16.msra.mxu0 %v901_v17  ;;  %v935_v34 = vpack.c.bf16 %v87_v30, %v86_v29  ;;  %v40_v37 = vld [vmem:[%s1651_s1 + $0x30] sm:$0xff]  ;;  %v907_v39 = vpack.c.bf16 %v57_v36, %v56_v35 }
   0xa   :  { %904 = vmatprep.subr.bf16.mxu0 %v903_v26  ;;  %v937_v38 = vpack.c.bf16 %v71_v32, %v70_v31  ;;  %v41_v40 = vld [vmem:[%s1651_s1 + $0x38] sm:$0xff]  ;;  %v88_v41 = vld [vmem:[%s1651_s1 + $0x1b0] sm:$0xff]  ;;  %v58_v46 = vld [vmem:[%s1651_s1 + $0xc0] sm:$0xff] }
   0xb   :  { %934 = vmatpush3.bf16.msra.mxu1 %v933_v25  ;;  %v89_v42 = vld [vmem:[%s1651_s1 + $0x1b8] sm:$0xff]  ;;  %v72_v44 = vld [vmem:[%s1651_s1 + $0x130] sm:$0xff]  ;;  %v59_v47 = vld [vmem:[%s1651_s1 + $0xc8] sm:$0xff]  ;;  %v909_v48 = vpack.c.bf16 %v41_v40, %v40_v37 }
   0xc   :  { %936 = vmatprep.subr.bf16.mxu1 %v935_v34  ;;  %v939_v43 = vpack.c.bf16 %v89_v42, %v88_v41  ;;  %v73_v45 = vld [vmem:[%s1651_s1 + $0x138] sm:$0xff]  ;;  %v90_v49 = vld [vmem:[%s1651_s1 + $0x1c0] sm:$0xff]  ;;  %v91_v50 = vld [vmem:[%s1651_s1 + $0x1c8] sm:$0xff]  ;;  %v911_v52 = vpack.c.bf16 %v59_v47, %v58_v46 }
   0xd   :  { %906 = vmatpush3.bf16.msra.mxu0 %v905_v33  ;;  %v941_v51 = vpack.c.bf16 %v73_v45, %v72_v44  ;;  %v42_v53 = vld [vmem:[%s1651_s1 + $0x40] sm:$0xff]  ;;  %v43_v54 = vld [vmem:[%s1651_s1 + $0x48] sm:$0xff]  ;;  %v943_v56 = vpack.c.bf16 %v91_v50, %v90_v49  ;;  %v60_v58 = vld [vmem:[%s1651_s1 + $0xd0] sm:$0xff] }
   0xe   :  { %908 = vmatprep.subr.bf16.mxu0 %v907_v39  ;;  %v74_v55 = vld [vmem:[%s1651_s1 + $0x140] sm:$0xff]  ;;  %v75_v57 = vld [vmem:[%s1651_s1 + $0x148] sm:$0xff]  ;;  %v61_v59 = vld [vmem:[%s1651_s1 + $0xd8] sm:$0xff]  ;;  %v913_v62 = vpack.c.bf16 %v43_v54, %v42_v53 }
   0xf   :  { %938 = vmatpush3.bf16.msra.mxu1 %v937_v38  ;;  %v92_v60 = vld [vmem:[%s1651_s1 + $0x1d0] sm:$0xff]  ;;  %v93_v61 = vld [vmem:[%s1651_s1 + $0x1d8] sm:$0xff]  ;;  %v945_v63 = vpack.c.bf16 %v75_v57, %v74_v55  ;;  %v915_v0 = vpack.c.bf16 %v61_v59, %v60_v58  ;;  %v62_v6 = vld [vmem:[%s1651_s1 + $0xe0] sm:$0xff] }
  0x10   :  { %940 = vmatprep.subr.bf16.mxu1 %v939_v43  ;;  %v44_v1 = vld [vmem:[%s1651_s1 + $0x50] sm:$0xff]  ;;  %v45_v2 = vld [vmem:[%s1651_s1 + $0x58] sm:$0xff]  ;;  %v947_v4 = vpack.c.bf16 %v93_v61, %v92_v60  ;;  %v63_v7 = vld [vmem:[%s1651_s1 + $0xe8] sm:$0xff] }
  0x11   :  { %910 = vmatpush3.bf16.msra.mxu0 %v909_v48  ;;  %v76_v3 = vld [vmem:[%s1651_s1 + $0x150] sm:$0xff]  ;;  %v77_v5 = vld [vmem:[%s1651_s1 + $0x158] sm:$0xff]  ;;  %v94_v8 = vld [vmem:[%s1651_s1 + $0x1e0] sm:$0xff]  ;;  %v917_v10 = vpack.c.bf16 %v45_v2, %v44_v1  ;;  %v919_v14 = vpack.c.bf16 %v63_v7, %v62_v6 }
  0x12   :  { %912 = vmatprep.subr.bf16.mxu0 %v911_v52  ;;  %v95_v9 = vld [vmem:[%s1651_s1 + $0x1e8] sm:$0xff]  ;;  %v46_v11 = vld [vmem:[%s1651_s1 + $0x60] sm:$0xff]  ;;  %v949_v13 = vpack.c.bf16 %v77_v5, %v76_v3  ;;  %v64_v19 = vld [vmem:[%s1651_s1 + $0xf0] sm:$0xff] }
  0x13   :  { %942 = vmatpush3.bf16.msra.mxu1 %v941_v51  ;;  %v47_v12 = vld [vmem:[%s1651_s1 + $0x68] sm:$0xff]  ;;  %v78_v15 = vld [vmem:[%s1651_s1 + $0x160] sm:$0xff]  ;;  %v951_v18 = vpack.c.bf16 %v95_v9, %v94_v8  ;;  %v65_v20 = vld [vmem:[%s1651_s1 + $0xf8] sm:$0xff] }
  0x14   :  { %944 = vmatprep.subr.bf16.mxu1 %v943_v56  ;;  %v79_v16 = vld [vmem:[%s1651_s1 + $0x168] sm:$0xff]  ;;  %v29_v21 = vld [vmem:[%s1652_s0 + $0x18] sm:$0xff]  ;;  %v96_v22 = vld [vmem:[%s1651_s1 + $0x1f0] sm:$0xff]  ;;  %v921_v24 = vpack.c.bf16 %v47_v12, %v46_v11  ;;  %v923_v26 = vpack.c.bf16 %v65_v20, %v64_v19 }
  0x15   :  { %914 = vmatpush3.bf16.msra.mxu0 %v913_v62  ;;  %v27_v17 = vld [vmem:[%s1652_s0 + $0x8] sm:$0xff]  ;;  %v97_v23 = vld [vmem:[%s1651_s1 + $0x1f8] sm:$0xff]  ;;  %303 = vmatprep.mubr.f32.mxu1 %v29_v21  ;;  %v953_v25 = vpack.c.bf16 %v79_v16, %v78_v15  ;;  %v48_v27 = vld [vmem:[%s1651_s1 + $0x70] sm:$0xff] }
  0x16   :  { %916 = vmatprep.subr.bf16.mxu0 %v915_v0  ;;  %233 = vmatprep.mubr.f32.mxu0 %v27_v17  ;;  %v49_v28 = vld [vmem:[%s1651_s1 + $0x78] sm:$0xff]  ;;  %v80_v29 = vld [vmem:[%s1651_s1 + $0x170] sm:$0xff]  ;;  %v955_v30 = vpack.c.bf16 %v97_v23, %v96_v22  ;;  %v114_v32 = vld [vmem:[%s1651_s1 + $0x280] sm:$0xff] }
  0x17   :  { %946 = vmatpush3.bf16.msra.mxu1 %v945_v63  ;;  %v81_v31 = vld [vmem:[%s1651_s1 + $0x178] sm:$0xff]  ;;  %v115_v33 = vld [vmem:[%s1651_s1 + $0x288] sm:$0xff]  ;;  %v146_v34 = vld [vmem:[%s1651_s1 + $0x380] sm:$0xff]  ;;  %v925_v36 = vpack.c.bf16 %v49_v28, %v48_v27 }
  0x18   :  { %948 = vmatprep.subr.bf16.mxu1 %v947_v4  ;;  %v147_v35 = vld [vmem:[%s1651_s1 + $0x388] sm:$0xff]  ;;  %v957_v37 = vpack.c.bf16 %v81_v31, %v80_v29  ;;  %v959_v38 = vpack.c.bf16 %v115_v33, %v114_v32  ;;  %v98_v39 = vld [vmem:[%s1651_s1 + $0x200] sm:$0xff]  ;;  %v116_v44 = vld [vmem:[%s1651_s1 + $0x290] sm:$0xff] }
  0x19   :  { %918 = vmatpush3.bf16.msra.mxu0 %v917_v10  ;;  %v99_v40 = vld [vmem:[%s1651_s1 + $0x208] sm:$0xff]  ;;  %v130_v41 = vld [vmem:[%s1651_s1 + $0x300] sm:$0xff]  ;;  %v991_v42 = vpack.c.bf16 %v147_v35, %v146_v34  ;;  %v117_v45 = vld [vmem:[%s1651_s1 + $0x298] sm:$0xff] }
  0x1a   :  { %920 = vmatprep.subr.bf16.mxu0 %v919_v14  ;;  %v131_v43 = vld [vmem:[%s1651_s1 + $0x308] sm:$0xff]  ;;  %v148_v46 = vld [vmem:[%s1651_s1 + $0x390] sm:$0xff]  ;;  %v149_v47 = vld [vmem:[%s1651_s1 + $0x398] sm:$0xff]  ;;  %v961_v49 = vpack.c.bf16 %v99_v40, %v98_v39  ;;  %v963_v52 = vpack.c.bf16 %v117_v45, %v116_v44 }
  0x1b   :  { %950 = vmatpush3.bf16.msra.mxu1 %v949_v13  ;;  %v26_v48 = vld [vmem:[%s1652_s0] sm:$0xff]  ;;  %v28_v50 = vld [vmem:[%s1652_s0 + $0x10] sm:$0xff]  ;;  %v993_v51 = vpack.c.bf16 %v131_v43, %v130_v41  ;;  %v101_v54 = vld [vmem:[%s1651_s1 + $0x218] sm:$0xff]  ;;  %v995_v56 = vpack.c.bf16 %v149_v47, %v148_v46 }
  0x1c   :  { %952 = vmatprep.subr.bf16.mxu1 %v951_v18  ;;  %v100_v53 = vld [vmem:[%s1651_s1 + $0x210] sm:$0xff]  ;;  %v133_v57 = vld [vmem:[%s1651_s1 + $0x318] sm:$0xff]  ;;  %v118_v58 = vld [vmem:[%s1651_s1 + $0x2a0] sm:$0xff] }
  0x1d   :  { %922 = vmatpush3.bf16.msra.mxu0 %v921_v24  ;;  %v132_v55 = vld [vmem:[%s1651_s1 + $0x310] sm:$0xff]  ;;  %v119_v59 = vld [vmem:[%s1651_s1 + $0x2a8] sm:$0xff]  ;;  %v150_v60 = vld [vmem:[%s1651_s1 + $0x3a0] sm:$0xff]  ;;  %v965_v62 = vpack.c.bf16 %v101_v54, %v100_v53 }
  0x1e   :  { %924 = vmatprep.subr.bf16.mxu0 %v923_v26  ;;  %v151_v61 = vld [vmem:[%s1651_s1 + $0x3a8] sm:$0xff]  ;;  %v997_v63 = vpack.c.bf16 %v133_v57, %v132_v55  ;;  %v967_v0 = vpack.c.bf16 %v119_v59, %v118_v58  ;;  %v102_v1 = vld [vmem:[%s1651_s1 + $0x220] sm:$0xff]  ;;  %v120_v6 = vld [vmem:[%s1651_s1 + $0x2b0] sm:$0xff] }
  0x1f   :  { %954 = vmatpush3.bf16.msra.mxu1 %v953_v25  ;;  %v103_v2 = vld [vmem:[%s1651_s1 + $0x228] sm:$0xff]  ;;  %v134_v3 = vld [vmem:[%s1651_s1 + $0x320] sm:$0xff]  ;;  %v999_v4 = vpack.c.bf16 %v151_v61, %v150_v60  ;;  %v121_v7 = vld [vmem:[%s1651_s1 + $0x2b8] sm:$0xff] }
  0x20   :  { %956 = vmatprep.subr.bf16.mxu1 %v955_v30  ;;  %v135_v5 = vld [vmem:[%s1651_s1 + $0x328] sm:$0xff]  ;;  %v152_v8 = vld [vmem:[%s1651_s1 + $0x3b0] sm:$0xff]  ;;  %v153_v9 = vld [vmem:[%s1651_s1 + $0x3b8] sm:$0xff]  ;;  %v969_v10 = vpack.c.bf16 %v103_v2, %v102_v1  ;;  %v971_v12 = vpack.c.bf16 %v121_v7, %v120_v6 }
  0x21   :  { %926 = vmatpush3.bf16.msra.mxu0 %v925_v36  ;;  %v1001_v11 = vpack.c.bf16 %v135_v5, %v134_v3  ;;  %v104_v13 = vld [vmem:[%s1651_s1 + $0x230] sm:$0xff]  ;;  %v105_v14 = vld [vmem:[%s1651_s1 + $0x238] sm:$0xff]  ;;  %v1003_v16 = vpack.c.bf16 %v153_v9, %v152_v8  ;;  %v122_v18 = vld [vmem:[%s1651_s1 + $0x2c0] sm:$0xff]  ;;  %v1076_v8 = vmov 0.0|0.0  }
  0x22   :  { %960 = vmatprep.subr.bf16.mxu0 %v959_v38  ;;  %v136_v15 = vld [vmem:[%s1651_s1 + $0x330] sm:$0xff]  ;;  %v137_v17 = vld [vmem:[%s1651_s1 + $0x338] sm:$0xff]  ;;  %v123_v19 = vld [vmem:[%s1651_s1 + $0x2c8] sm:$0xff]  ;;  %v973_v22 = vpack.c.bf16 %v105_v14, %v104_v13 }
  0x23   :  { %958 = vmatpush3.bf16.msra.mxu1 %v957_v37  ;;  %v154_v20 = vld [vmem:[%s1651_s1 + $0x3c0] sm:$0xff]  ;;  %v155_v21 = vld [vmem:[%s1651_s1 + $0x3c8] sm:$0xff]  ;;  %v33_v24 = vld [vmem:[%s1652_s0 + $0x38] sm:$0xff]  ;;  %v1005_v25 = vpack.c.bf16 %v137_v17, %v136_v15  ;;  %v975_v26 = vpack.c.bf16 %v123_v19, %v122_v18 }
  0x24   :  { %992 = vmatprep.subr.bf16.mxu1 %v991_v42  ;;  %234 = vmatmul.mubr.f32.vlgmr.msra.gmra.mrb[0].mxu0 %v26_v48  ;;  %v31_v23 = vld [vmem:[%s1652_s0 + $0x28] sm:$0xff]  ;;  %v106_v27 = vld [vmem:[%s1651_s1 + $0x240] sm:$0xff]  ;;  %v1007_v30 = vpack.c.bf16 %v155_v21, %v154_v20  ;;  %v124_v32 = vld [vmem:[%s1651_s1 + $0x2d0] sm:$0xff] }
  0x25   :  { %962 = vmatpush3.bf16.msra.mxu0 %v961_v49  ;;  %v107_v28 = vld [vmem:[%s1651_s1 + $0x248] sm:$0xff]  ;;  %v138_v29 = vld [vmem:[%s1651_s1 + $0x340] sm:$0xff]  ;;  %v125_v33 = vld [vmem:[%s1651_s1 + $0x2d8] sm:$0xff]  ;;  %373 = vmatprep.mubr.f32.mxu0 %v31_v23 }
  0x26   :  { %304 = vmatmul.mubr.f32.vlgmr.msra.gmra.mrb[0].mxu1 %v28_v50  ;;  %964 = vmatprep.subr.bf16.mxu0 %v963_v52  ;;  %v139_v31 = vld [vmem:[%s1651_s1 + $0x348] sm:$0xff]  ;;  %v156_v34 = vld [vmem:[%s1651_s1 + $0x3d0] sm:$0xff]  ;;  %v157_v35 = vld [vmem:[%s1651_s1 + $0x3d8] sm:$0xff]  ;;  %v977_v36 = vpack.c.bf16 %v107_v28, %v106_v27  ;;  %v979_v38 = vpack.c.bf16 %v125_v33, %v124_v32  ;;  %v1078_v33 = vmov 0.0  }
  0x27   :  { %994 = vmatpush3.bf16.msra.mxu1 %v993_v51  ;;  %443 = vmatprep.mubr.f32.mxu1 %v33_v24  ;;  %v1009_v37 = vpack.c.bf16 %v139_v31, %v138_v29  ;;  %v108_v39 = vld [vmem:[%s1651_s1 + $0x250] sm:$0xff]  ;;  %v109_v40 = vld [vmem:[%s1651_s1 + $0x258] sm:$0xff]  ;;  %v1011_v42 = vpack.c.bf16 %v157_v35, %v156_v34  ;;  %v126_v44 = vld [vmem:[%s1651_s1 + $0x2e0] sm:$0xff] }
  0x28   :  { %996 = vmatprep.subr.bf16.mxu1 %v995_v56  ;;  %v140_v41 = vld [vmem:[%s1651_s1 + $0x350] sm:$0xff]  ;;  %v141_v43 = vld [vmem:[%s1651_s1 + $0x358] sm:$0xff]  ;;  %v127_v45 = vld [vmem:[%s1651_s1 + $0x2e8] sm:$0xff]  ;;  %v981_v48 = vpack.c.bf16 %v109_v40, %v108_v39 }
  0x29   :  { %966 = vmatpush3.bf16.msra.mxu0 %v965_v62  ;;  %v158_v46 = vld [vmem:[%s1651_s1 + $0x3e0] sm:$0xff]  ;;  %v159_v47 = vld [vmem:[%s1651_s1 + $0x3e8] sm:$0xff]  ;;  %v1013_v49 = vpack.c.bf16 %v141_v43, %v140_v41  ;;  %v983_v50 = vpack.c.bf16 %v127_v45, %v126_v44  ;;  %v128_v56 = vld [vmem:[%s1651_s1 + $0x2f0] sm:$0xff] }
  0x2a   :  { %968 = vmatprep.subr.bf16.mxu0 %v967_v0  ;;  %v110_v51 = vld [vmem:[%s1651_s1 + $0x260] sm:$0xff]  ;;  %v111_v52 = vld [vmem:[%s1651_s1 + $0x268] sm:$0xff]  ;;  %v1015_v54 = vpack.c.bf16 %v159_v47, %v158_v46  ;;  %v129_v57 = vld [vmem:[%s1651_s1 + $0x2f8] sm:$0xff] }
  0x2b   :  { %998 = vmatpush3.bf16.msra.mxu1 %v997_v63  ;;  %v142_v53 = vld [vmem:[%s1651_s1 + $0x360] sm:$0xff]  ;;  %v143_v55 = vld [vmem:[%s1651_s1 + $0x368] sm:$0xff]  ;;  %v160_v58 = vld [vmem:[%s1651_s1 + $0x3f0] sm:$0xff]  ;;  %v985_v60 = vpack.c.bf16 %v111_v52, %v110_v51  ;;  %v987_v62 = vpack.c.bf16 %v129_v57, %v128_v56 }
  0x2c   :  { %1000 = vmatprep.subr.bf16.mxu1 %v999_v4  ;;  %v161_v59 = vld [vmem:[%s1651_s1 + $0x3f8] sm:$0xff]  ;;  %v1017_v61 = vpack.c.bf16 %v143_v55, %v142_v53  ;;  %v112_v63 = vld [vmem:[%s1651_s1 + $0x270] sm:$0xff]  ;;  %v30_v6 = vld [vmem:[%s1652_s0 + $0x20] sm:$0xff] }
  0x2d   :  { %970 = vmatpush3.bf16.msra.mxu0 %v969_v10  ;;  %v113_v0 = vld [vmem:[%s1651_s1 + $0x278] sm:$0xff]  ;;  %v1019_v1 = vpack.c.bf16 %v161_v59, %v160_v58  ;;  %v144_v2 = vld [vmem:[%s1651_s1 + $0x370] sm:$0xff]  ;;  %v450_v9 = vld [vmem:[%s1653_s3] sm:$0xff] }
  0x2e   :  { %972 = vmatprep.subr.bf16.mxu0 %v971_v12  ;;  %v145_v3 = vld [vmem:[%s1651_s1 + $0x378] sm:$0xff]  ;;  %v989_v4 = vpack.c.bf16 %v113_v0, %v112_v63  ;;  %v32_v7 = vld [vmem:[%s1652_s0 + $0x30] sm:$0xff]  ;;  %v451_v10 = vld [vmem:[%s1653_s3 + $0x8] sm:$0xff] }
  0x2f   :  { %1002 = vmatpush3.bf16.msra.mxu1 %v1001_v11  ;;  %v1021_v5 = vpack.c.bf16 %v145_v3, %v144_v2  ;;  %v452_v11 = vld [vmem:[%s1653_s3 + $0x10] sm:$0xff]  ;;  %v1024_v12 = vpack.c.bf16 %v451_v10, %v450_v9  ;;  %v453_v13 = vld [vmem:[%s1653_s3 + $0x18] sm:$0xff]  ;;  %v454_v15 = vld [vmem:[%s1653_s3 + $0x20] sm:$0xff] }
  0x30   :  { %1004 = vmatprep.subr.bf16.mxu1 %v1003_v16  ;;  %v1027_v14 = vpack.c.bf16 %v453_v13, %v452_v11  ;;  %v455_v16 = vld [vmem:[%s1653_s3 + $0x28] sm:$0xff]  ;;  %v456_v18 = vld [vmem:[%s1653_s3 + $0x30] sm:$0xff]  ;;  %v457_v19 = vld [vmem:[%s1653_s3 + $0x38] sm:$0xff] }
  0x31   :  { %974 = vmatpush3.bf16.msra.mxu0 %v973_v22  ;;  %v1030_v17 = vpack.c.bf16 %v455_v16, %v454_v15  ;;  %v1033_v20 = vpack.c.bf16 %v457_v19, %v456_v18  ;;  %v458_v21 = vld [vmem:[%s1653_s3 + $0x40] sm:$0xff]  ;;  %v459_v22 = vld [vmem:[%s1653_s3 + $0x48] sm:$0xff]  ;;  %v460_v24 = vld [vmem:[%s1653_s3 + $0x50] sm:$0xff] }
  0x32   :  { %976 = vmatprep.subr.bf16.mxu0 %v975_v26  ;;  %v1036_v23 = vpack.c.bf16 %v459_v22, %v458_v21  ;;  %v462_v27 = vld [vmem:[%s1653_s3 + $0x60] sm:$0xff]  ;;  %v463_v28 = vld [vmem:[%s1653_s3 + $0x68] sm:$0xff]  ;;  %v465_v31 = vld [vmem:[%s1653_s3 + $0x78] sm:$0xff] }
  0x33   :  { %1006 = vmatpush3.bf16.msra.mxu1 %v1005_v25  ;;  %v461_v25 = vld [vmem:[%s1653_s3 + $0x58] sm:$0xff]  ;;  %v1042_v29 = vpack.c.bf16 %v463_v28, %v462_v27  ;;  %v544_v34 = vld [vmem:[%s1654_s5] sm:$0xff]  ;;  %v545_v35 = vld [vmem:[%s1654_s5 + $0x8] sm:$0xff] }
  0x34   :  { %1008 = vmatprep.subr.bf16.mxu1 %v1007_v30  ;;  %v1039_v26 = vpack.c.bf16 %v461_v25, %v460_v24  ;;  %v464_v30 = vld [vmem:[%s1653_s3 + $0x70] sm:$0xff]  ;;  %v548_v40 = vld [vmem:[%s1654_s5 + $0x20] sm:$0xff]  ;;  %v549_v41 = vld [vmem:[%s1654_s5 + $0x28] sm:$0xff] }
  0x35   :  { %978 = vmatpush3.bf16.msra.mxu0 %v977_v36  ;;  %v1045_v32 = vpack.c.bf16 %v465_v31, %v464_v30  ;;  %v546_v36 = vld [vmem:[%s1654_s5 + $0x10] sm:$0xff]  ;;  %v551_v44 = vld [vmem:[%s1654_s5 + $0x38] sm:$0xff]  ;;  %v552_v46 = vld [vmem:[%s1654_s5 + $0x40] sm:$0xff] }
  0x36   :  { %980 = vmatprep.subr.bf16.mxu0 %v979_v38  ;;  %v547_v38 = vld [vmem:[%s1654_s5 + $0x18] sm:$0xff]  ;;  %v550_v43 = vld [vmem:[%s1654_s5 + $0x30] sm:$0xff]  ;;  %v553_v47 = vld [vmem:[%s1654_s5 + $0x48] sm:$0xff] }
  0x37   :  { %1010 = vmatpush3.bf16.msra.mxu1 %v1009_v37  ;;  %v1048_v37 = vpack.c.bf16 %v545_v35, %v544_v34  ;;  %v1051_v39 = vpack.c.bf16 %v547_v38, %v546_v36  ;;  %v1057_v45 = vpack.c.bf16 %v551_v44, %v550_v43  ;;  %v556_v52 = vld [vmem:[%s1654_s5 + $0x60] sm:$0xff]  ;;  %v557_v53 = vld [vmem:[%s1654_s5 + $0x68] sm:$0xff]  ;;  %v558_v9 = vld [vmem:[%s1654_s5 + $0x70] sm:$0xff] }
  0x38   :  { %1012 = vmatprep.subr.bf16.mxu1 %v1011_v42  ;;  %v1054_v42 = vpack.c.bf16 %v549_v41, %v548_v40  ;;  %v648_v56 = vld [vmem:[%s1655_s2] ss:$0 sm:$0xff]  ;;  %v559_v10 = vld [vmem:[%s1654_s5 + $0x78] sm:$0xff] }
  0x39   :  { %982 = vmatpush3.bf16.msra.mxu0 %v981_v48  ;;  %v1060_v48 = vpack.c.bf16 %v553_v47, %v552_v46  ;;  %v1069_v11 = vpack.c.bf16 %v559_v10, %v558_v9 }
  0x3a   :  { %984 = vmatprep.subr.bf16.mxu0 %v983_v50  ;;  %v555_v50 = vld [vmem:[%s1654_s5 + $0x58] sm:$0xff] }
  0x3b   :  { %1014 = vmatpush3.bf16.msra.mxu1 %v1013_v49  ;;  %v554_v49 = vld [vmem:[%s1654_s5 + $0x50] sm:$0xff] }
  0x3c   :  { %1016 = vmatprep.subr.bf16.mxu1 %v1015_v54  ;;  %v1063_v51 = vpack.c.bf16 %v555_v50, %v554_v49  ;;  %v1066_v54 = vpack.c.bf16 %v557_v53, %v556_v52 }
  0x3d   :  { %986 = vmatpush3.bf16.msra.mxu0 %v985_v60 }
  0x3e   :  { %988 = vmatprep.subr.bf16.mxu0 %v987_v62 }
  0x3f   :  { %1018 = vmatpush3.bf16.msra.mxu1 %v1017_v61 }
  0x40   :  { %1020 = vmatprep.subr.bf16.mxu1 %v1019_v1 }
  0x41   :  { %990 = vmatpush3.bf16.msra.mxu0 %v989_v4 }
  0x42   :  { %1023 = vmatprep.subr.bf16.mxu0 %v1076_v8 }
  0x43   :  { %1022 = vmatpush3.bf16.msra.mxu1 %v1021_v5 }
  0x44   :  { %374 = vmatmul.mubr.f32.vlgmr.msra.gmra.mrb[2].mxu0 %v30_v6  ;;  %1047 = vmatprep.subr.bf16.mxu1 %v1076_v8 }
  0x45   :  { %1025 = vmatpush3.bf16.msra.mxu0 %v1024_v12  ;;  %857 = vmatprep.mubr.msk.f32.mxu0 %vm1077_vm0, %v1078_v33  ;;  %v649_v12 = vld [vmem:[%s1656_s4] ss:$0 sm:$0xff] }
  0x46   :  { %444 = vmatmul.mubr.f32.vlgmr.msra.gmra.mrb[2].mxu1 %v32_v7  ;;  %1026 = vmatprep.subr.bf16.mxu0 %v1076_v8 }
  0x47   :  { %892 = vmatprep.mubr.msk.f32.mxu1 %vm1077_vm0, %v1078_v33  ;;  %1049 = vmatpush3.bf16.msra.mxu1 %v1048_v37 }
  0x48   :  { %1050 = vmatprep.subr.bf16.mxu1 %v1076_v8 }
  0x49   :  { %1028 = vmatpush3.bf16.msra.mxu0 %v1027_v14 }
  0x4a   :  { %1029 = vmatprep.subr.bf16.mxu0 %v1076_v8 }
  0x4b   :  { %1052 = vmatpush3.bf16.msra.mxu1 %v1051_v39 }
  0x4c   :  { %1053 = vmatprep.subr.bf16.mxu1 %v1076_v8 }
  0x4d   :  { %1031 = vmatpush3.bf16.msra.mxu0 %v1030_v17  ;;  %v650_v17 = vld [vmem:[%s1657_s6] ss:$0 sm:$0xff] }
  0x4e   :  { %1032 = vmatprep.subr.bf16.mxu0 %v1076_v8 }
  0x4f   :  { %1055 = vmatpush3.bf16.msra.mxu1 %v1054_v42 }
  0x50   :  { %1056 = vmatprep.subr.bf16.mxu1 %v1076_v8 }
  0x51   :  { %1034 = vmatpush3.bf16.msra.mxu0 %v1033_v20 }
  0x52   :  { %1035 = vmatprep.subr.bf16.mxu0 %v1076_v8 }
  0x53   :  { %1058 = vmatpush3.bf16.msra.mxu1 %v1057_v45 }
  0x54   :  { %1059 = vmatprep.subr.bf16.mxu1 %v1076_v8 }
  0x55   :  { %1037 = vmatpush3.bf16.msra.mxu0 %v1036_v23 }
  0x56   :  { %1038 = vmatprep.subr.bf16.mxu0 %v1076_v8 }
  0x57   :  { %1061 = vmatpush3.bf16.msra.mxu1 %v1060_v48 }
  0x58   :  { %1062 = vmatprep.subr.bf16.mxu1 %v1076_v8 }
  0x59   :  { %1040 = vmatpush3.bf16.msra.mxu0 %v1039_v26 }
  0x5a   :  { %1041 = vmatprep.subr.bf16.mxu0 %v1076_v8 }
  0x5b   :  { %1064 = vmatpush3.bf16.msra.mxu1 %v1063_v51 }
  0x5c   :  { %1065 = vmatprep.subr.bf16.mxu1 %v1076_v8 }
  0x5d   :  { %1043 = vmatpush3.bf16.msra.mxu0 %v1042_v29 }
  0x5e   :  { %1044 = vmatprep.subr.bf16.mxu0 %v1076_v8 }
  0x5f   :  { %1067 = vmatpush3.bf16.msra.mxu1 %v1066_v54 }
  0x60   :  { %1068 = vmatprep.subr.bf16.mxu1 %v1076_v8 }
  0x61   :  { %1046 = vmatpush3.bf16.msra.mxu0 %v1045_v32 }
  0x63   :  { %1070 = vmatpush3.bf16.msra.mxu1 %v1069_v11 }
  0xf7   :  { %v683_v55 = vpop.f32.mrb[0].mxu0 }
  0xf8   :  { %v684_v57 = vpop.f32.mrb[1].mxu0 }
  0xf9   :  { %v718_v58 = vpop.f32.mrb[0].mxu1  ;;  %v685_v59 = vadd.f32 %v684_v57, %v683_v55 }
  0xfa   :  { %v719_v60 = vpop.f32.mrb[1].mxu1 }
  0xfb   :  { %v720_v61 = vadd.f32 %v719_v60, %v718_v58  ;;  %v236_v62 = vadd.f32 %v685_v59, %v648_v56 }
  0xfd   :  { %v306_v63 = vadd.f32 %v720_v61, %v236_v62 }
 0x117   :  { %v753_v0 = vpop.f32.mrb[2].mxu0 }
 0x118   :  { %v754_v1 = vpop.f32.mrb[3].mxu0 }
 0x119   :  { %v788_v2 = vpop.f32.mrb[2].mxu1  ;;  %v755_v3 = vadd.f32 %v754_v1, %v753_v0 }
 0x11a   :  { %v789_v4 = vpop.f32.mrb[3].mxu1 }
 0x11b   :  { %v790_v5 = vadd.f32 %v789_v4, %v788_v2  ;;  %v376_v6 = vadd.f32 %v755_v3, %v306_v63 }
 0x11d   :  { %v446_v7 = vadd.f32 %v790_v5, %v376_v6 }
 0x11f   :  { %v449_v8 = vmax.f32 %v446_v7, 0.0 }
 0x121   :  { %858 = vmatmul.mubr.f32.vlgmr.msra.gmra.mrb[4].mxu0 %v449_v8 }
 0x1f4   :  { %v539_v13 = vpop.f32.mrb[4].mxu0 }
 0x1f5   :  { %v540_v14 = vadd.f32 %v649_v12, %v539_v13  ;;  %v859_v15 = vpop.f32.mrb[5].mxu0 }
 0x1f7   :  { %v543_v16 = vmax.f32 %v540_v14, 0.0 }
 0x1f9   :  { %893 = vmatmul.mubr.f32.vlgmr.msra.gmra.mrb[4].mxu1 %v543_v16 }
 0x2cc   :  { %v633_v18 = vpop.f32.mrb[4].mxu1 }
 0x2cd   :  { %v634_v19 = vadd.f32 %v650_v17, %v633_v18  ;;  %v894_v20 = vpop.f32.mrb[5].mxu1 }
 0x2cf   :  { %v637_v21 = vmul.f32 %v634_v19, %v634_v19 }
 0x2d1   :  { %638 = vadd.xlane.f32.xlu0 %v637_v21 }
 0x35e   :  { %v639_v22 = vpop.xlane.xlu0 %638 }
 0x35f   :  { %v640_v23 = vmax.f32 %v639_v22, 1e-24 }
 0x361   :  { %1074 = vrsqrt.f32 %v640_v23 }
 0x36b   :  { %v1075_v24 = vpop.eup %1074 }
 0x36c   :  { %v642_v25 = vmul.f32 %v1075_v24, %v634_v19 }
 0x36e   :  { %643 = vst [vmem:[%s1658_s7] sm:$0xff] %v642_v25 }

</bundles_post_ra>
